<compile_context>
chip_gen: v7x
topology: tpu7x:2x2x1
jax: 0.10.0
libtpu: 0.0.40
codegen_flags: <defaults>
</compile_context>

<pallas_src>
import math

import jax
import jax.numpy as jnp
from jax.experimental import pallas as pl
from jax.experimental.pallas import tpu as pltpu

IN_CHANNELS = 4
OUT_CHANNELS = 64
KMAX = 7            # largest kernel size; all branches embedded into 7 taps
PAD = KMAX // 2     # 3
_LANE = 128


def _cdiv(a, b):
    return -(-a // b)


def _round_up(v, m):
    return _cdiv(v, m) * m


# ---------------------------------------------------------------------------
# Kernel
# ---------------------------------------------------------------------------
def _conv_bank_kernel(y_ref, w_ref, b_ref, o_ref):
    """One grid step: `tb` independent batch segments.

    y_ref: (tb, lp2, 2*C_in)   f32 pair-packed, zero-padded input rows
                               (pair row j = padded timesteps 2j, 2j+1)
    w_ref: (4*2*C_in, 2*C_out) polyphase im2col weights (compute dtype)
    b_ref: (1, 2*C_out)        f32 bias (even | odd phase halves)
    o_ref: (tb, m, 2*C_out)    m output pair rows per segment
    """
    tb, m, _ = o_ref.shape
    w = w_ref[...]
    b = b_ref[...]

    def one_segment(bb, carry):
        y = y_ref[bb]                                                     # (lp2, 8)
        # im2col: output pair i's receptive field = input pair rows i..i+3
        # (8 padded timesteps).  Only the m stored rows are built/matmul'd.
        x2 = jnp.concatenate([y[k:k + m, :] for k in range(4)], axis=-1)  # (m, 32)
        acc = jnp.dot(x2.astype(w.dtype), w,
                      preferred_element_type=jnp.float32)                 # (m, 128)
        o_ref[bb] = jnp.maximum(acc + b, 0.0).astype(o_ref.dtype)
        return carry

    jax.lax.fori_loop(0, tb, one_segment, None, unroll=(tb <= 8))


# ---------------------------------------------------------------------------
# Weight packing
# ---------------------------------------------------------------------------
def pack_conv_bank(w_fused, b_fused):
    """(KMAX, C_in, C_out) fused taps -> polyphase im2col weights.

    Returns w2 ((KMAX+1)*C_in, 2*C_out) and b2 (1, 2*C_out).  Columns
    [0, C_out) produce the even output timestep of a pair, columns
    [C_out, 2*C_out) the odd one (taps shifted by one input row = C_in rows).
    """
    kmax, c_in, c_out = w_fused.shape
    w_flat = w_fused.reshape(kmax * c_in, c_out).astype(jnp.float32)
    w2 = jnp.zeros((c_in * (kmax + 1), 2 * c_out), jnp.float32)
    w2 = w2.at[:kmax * c_in, :c_out].set(w_flat)     # even phase: rows 0..27
    w2 = w2.at[c_in:, c_out:].set(w_flat)            # odd phase:  rows 4..31
    b2 = jnp.concatenate([b_fused, b_fused]).reshape(1, 2 * c_out).astype(jnp.float32)
    return w2, b2


# ---------------------------------------------------------------------------
# Chip-aware block sizing
# ---------------------------------------------------------------------------
# Per-pair-row VMEM cost (bytes), counting lane padding (the 8-lane input
# block pads to 128 lanes) and double buffering of the pipelined blocks, plus
# in-kernel im2col / accumulator temporaries.
_BYTES_PER_PAIR_ROW = (
    2 * 4 * _LANE          # input block  (f32, 8 -> 128 lane-padded, double-buffered)
    + 2 * 4 * _LANE        # output block (f32, 128 lanes, double-buffered)
    + (2 + 4 + 4) * _LANE  # im2col (bf16) + matmul / ReLU temporaries (f32)
)


def _vmem_plan():
    """Block-row budget, explicit scoped-VMEM limit, and multi-TC flag."""
    vmem_cap = 64 << 20            # conservative fallback (= v7x per-TC VMEM)
    try:
        info = pltpu.get_tpu_info()
        vmem_cap = int(getattr(info, "vmem_capacity_bytes", vmem_cap))
    except Exception:
        pass
    # v7x reports 64 MiB per TensorCore (2 TCs/chip); v5e/v6e 128 MiB (1 TC).
    multi_core = vmem_cap < (96 << 20)
    vmem_limit = max(32 << 20, min(vmem_cap * 3 // 4, 96 << 20))
    max_rows = (vmem_limit // 2) // _BYTES_PER_PAIR_ROW
    max_rows = max(256, min(max_rows // 8 * 8, 16384))
    return max_rows, int(vmem_limit), multi_core


# ---------------------------------------------------------------------------
# Forward wrapper
# ---------------------------------------------------------------------------
def conv_forward(x, w2, b2, *, compute_dtype=jnp.bfloat16, max_pair_rows=None):
    """Fused multi-kernel Conv1d bank + ReLU (+ eval-mode dropout = identity).

    x: (B, L, C_in) float32 -> (B, L, C_out)  (w2, b2 from pack_conv_bank).
    """
    B, L, c_in = x.shape
    c_out2 = w2.shape[-1]
    c_out = c_out2 // 2

    max_rows, vmem_limit, multi_core = _vmem_plan()
    if max_pair_rows is not None:
        max_rows = int(max_pair_rows)

    # --- sequence chunking: bound per-block size for any L -----------------
    m_total = _cdiv(L, 2)                 # output timestep pairs
    if m_total <= max_rows:
        m_c, S = m_total, 1               # one segment per batch element
    else:
        m_c, S = max_rows, _cdiv(m_total, max_rows)
    lp2 = _round_up(m_c + 3, 8)           # input pair rows per segment (3-row halo)

    # "same"-conv zero padding; segment s covers padded timesteps
    # [2*s*m_c, 2*s*m_c + 2*lp2).  Halo duplication is negligible (C_in = 4).
    lpad = 2 * (S - 1) * m_c + 2 * lp2
    x_pad = jnp.zeros((B, lpad, c_in), x.dtype).at[:, PAD:PAD + L, :].set(x)
    segs = jnp.stack(
        [x_pad[:, 2 * s * m_c:2 * s * m_c + 2 * lp2, :] for s in range(S)], axis=1)
    y = segs.reshape(B * S, lp2, 2 * c_in)      # pair-packed (contiguous reshape)

    bs = B * S                                   # virtual batch of segments
    w_call = w2.astype(compute_dtype)

    # --- segments per grid step --------------------------------------------
    tb = max(1, min(bs, max_rows // max(m_c, 1)))
    # On 2-TC chips only, prefer >=2 grid steps (shards the parallel axis
    # across cores) -- and only when each step still carries plenty of rows.
    if multi_core and tb == bs and bs > 1 and (bs * m_c) // 2 >= 1024:
        tb = _cdiv(bs, 2)
    grid = (_cdiv(bs, tb),)                      # partial last block is masked

    out_packed = pl.pallas_call(
        _conv_bank_kernel,
        out_shape=jax.ShapeDtypeStruct((bs, m_c, c_out2), x.dtype),
        grid_spec=pltpu.PrefetchScalarGridSpec(
            num_scalar_prefetch=0,
            grid=grid,
            in_specs=[
                pl.BlockSpec((tb, lp2, 2 * c_in), lambda g: (g, 0, 0)),
                pl.BlockSpec(w_call.shape,        lambda g: (0, 0)),
                pl.BlockSpec(b2.shape,            lambda g: (0, 0)),
            ],
            out_specs=pl.BlockSpec((tb, m_c, c_out2), lambda g: (g, 0, 0)),
        ),
        compiler_params=pltpu.CompilerParams(
            dimension_semantics=("parallel",),
            vmem_limit_bytes=vmem_limit),
    )(y, w_call, b2)

    # (bs, m_c, 2*C_out) -> (B, 2*S*m_c, C_out): the pair halves live in lane
    # halves [0, C_out) / [C_out, 2*C_out), so this contiguous reshape
    # de-interleaves exactly; slice only when needed (odd L / chunk padding).
    out = out_packed.reshape(B, 2 * S * m_c, c_out)
    if 2 * S * m_c != L:
        out = out[:, :L, :]
    return out


# ---------------------------------------------------------------------------
# Deterministic parameter init (mimics nn.Conv1d defaults)
# ---------------------------------------------------------------------------
def make_params(key, in_channels=IN_CHANNELS, out_channels=OUT_CHANNELS):
    """Returns fused weight (KMAX, C_in, C_out) and bias (C_out,); each
    branch's taps are centered inside the 7-tap window, zeros elsewhere."""
    c_br = out_channels // 4
    w_fused = jnp.zeros((KMAX, in_channels, out_channels), jnp.float32)
    b_fused = jnp.zeros((out_channels,), jnp.float32)
    for i, k in enumerate((1, 3, 5, 7)):
        key, kw, kb = jax.random.split(key, 3)
        bound = 1.0 / math.sqrt(in_channels * k)
        w = jax.random.uniform(kw, (c_br, in_channels, k),
                               minval=-bound, maxval=bound, dtype=jnp.float32)
        b = jax.random.uniform(kb, (c_br,),
                               minval=-bound, maxval=bound, dtype=jnp.float32)
        w_t = jnp.transpose(w, (2, 1, 0))                      # (k, C_in, c_br)
        t0 = PAD - k // 2                                      # center the taps
        w_fused = w_fused.at[t0:t0 + k, :, i * c_br:(i + 1) * c_br].set(w_t)
        b_fused = b_fused.at[i * c_br:(i + 1) * c_br].set(b)
    return w_fused, b_fused


if __name__ == "__main__":
    key = jax.random.PRNGKey(0)
    k_x, k_p = jax.random.split(key)

    B, L = 2, 16
    x = jax.random.normal(k_x, (B, L, IN_CHANNELS), dtype=jnp.float32)
    w_fused, b_fused = make_params(k_p)
    w2, b2 = pack_conv_bank(w_fused, b_fused)

    def reference(xin):
        xp = jnp.pad(xin, ((0, 0), (PAD, PAD), (0, 0)))
        ll = xin.shape[1]
        r = jnp.zeros((xin.shape[0], ll, OUT_CHANNELS), jnp.float32)
        for t in range(KMAX):
            r = r + jnp.einsum("blc,co->blo", xp[:, t:t + ll, :], w_fused[t])
        return jnp.maximum(r + b_fused, 0.0)

    ref = reference(x)

    # Exact path (f32 MXU operands) -- tight tolerance.
    out32 = conv_forward(x, w2, b2, compute_dtype=jnp.float32)
    jax.block_until_ready(out32)
    assert out32.shape == (B, L, OUT_CHANNELS), out32.shape
    assert jnp.allclose(out32, ref, atol=1e-5, rtol=1e-5)

    # Default perf path (bf16 MXU operands, f32 accumulation).
    out = conv_forward(x, w2, b2)
    jax.block_until_ready(out)
    assert jnp.allclose(out, ref, atol=5e-2, rtol=5e-2)

    # Odd L, odd batch, forced sequence chunking (multi-step grid).
    B2, L2 = 3, 37
    x_b = jax.random.normal(jax.random.PRNGKey(1), (B2, L2, IN_CHANNELS), jnp.float32)
    ref_b = reference(x_b)
    out_b = conv_forward(x_b, w2, b2, compute_dtype=jnp.float32, max_pair_rows=8)
    jax.block_until_ready(out_b)
    assert out_b.shape == (B2, L2, OUT_CHANNELS), out_b.shape
    assert jnp.allclose(out_b, ref_b, atol=1e-5, rtol=1e-5)

    print("KERNEL_OK")
</pallas_src>

<mosaic_0001>
module attributes {stable_mosaic.version = 11 : i64} {
  func.func @_conv_bank_kernel(%arg0: i32, %arg1: memref<2x16x8xf32, #tpu.memory_space<vmem>>, %arg2: memref<32x128xf32, #tpu.memory_space<vmem>>, %arg3: memref<1x128xf32, #tpu.memory_space<vmem>>, %arg4: memref<2x8x128xf32, #tpu.memory_space<vmem>>) attributes {dimension_semantics = [#tpu.dimension_semantics<parallel>], iteration_bounds = array<i64: 1>, scalar_prefetch = 0 : i64, scratch_operands = 0 : i64, tpu.core_type = #tpu.core_type<tc>, window_params = [{transform_indices = @transform_0, window_bounds = array<i64: 2, 16, 8>}, {pipeline_mode = #tpu.pipeline_mode<synchronous>, transform_indices = @transform_1, window_bounds = array<i64: 32, 128>}, {pipeline_mode = #tpu.pipeline_mode<synchronous>, transform_indices = @transform_2, window_bounds = array<i64: 1, 128>}, {transform_indices = @transform_3, window_bounds = array<i64: 2, 8, 128>}]} {
    %c0 = arith.constant 0 : index
    %c0_0 = arith.constant 0 : index
    %0 = vector.load %arg2[%c0, %c0_0] : memref<32x128xf32, #tpu.memory_space<vmem>>, vector<32x128xf32>
    %c0_1 = arith.constant 0 : index
    %c0_2 = arith.constant 0 : index
    %1 = vector.load %arg3[%c0_1, %c0_2] : memref<1x128xf32, #tpu.memory_space<vmem>>, vector<1x128xf32>
    %c0_i32 = arith.constant 0 : i32
    %2 = arith.index_cast %c0_i32 : i32 to index
    %c0_3 = arith.constant 0 : index
    %c0_4 = arith.constant 0 : index
    %3 = vector.load %arg1[%2, %c0_3, %c0_4] : memref<2x16x8xf32, #tpu.memory_space<vmem>>, vector<1x16x8xf32>
    %4 = vector.shape_cast %3 : vector<1x16x8xf32> to vector<16x8xf32>
    %5 = vector.extract_strided_slice %4 {offsets = [0, 0], sizes = [8, 8], strides = [1, 1]} : vector<16x8xf32> to vector<8x8xf32>
    %6 = vector.extract_strided_slice %4 {offsets = [1, 0], sizes = [8, 8], strides = [1, 1]} : vector<16x8xf32> to vector<8x8xf32>
    %7 = vector.extract_strided_slice %4 {offsets = [2, 0], sizes = [8, 8], strides = [1, 1]} : vector<16x8xf32> to vector<8x8xf32>
    %8 = vector.extract_strided_slice %4 {offsets = [3, 0], sizes = [8, 8], strides = [1, 1]} : vector<16x8xf32> to vector<8x8xf32>
    %9 = tpu.concatenate %5, %6, %7, %8 in 1 : vector<8x8xf32>, vector<8x8xf32>, vector<8x8xf32>, vector<8x8xf32> -> vector<8x32xf32>
    %cst = arith.constant dense<0.000000e+00> : vector<8x128xf32>
    %10 = tpu.matmul %9, %0, %cst {dimension_numbers = #tpu.dot_dimension_numbers<[1], [0], [0], [1], [0, 0, 1, 1], [], []>} : vector<8x32xf32>, vector<32x128xf32>, vector<8x128xf32> -> vector<8x128xf32>
    %11 = vector.broadcast %1 : vector<1x128xf32> to vector<8x128xf32>
    %12 = arith.addf %10, %11 : vector<8x128xf32>
    %cst_5 = arith.constant 0.000000e+00 : f32
    %13 = vector.broadcast %cst_5 : f32 to vector<8x128xf32>
    %14 = arith.maximumf %12, %13 : vector<8x128xf32>
    %15 = arith.index_cast %c0_i32 : i32 to index
    %c0_6 = arith.constant 0 : index
    %c0_7 = arith.constant 0 : index
    %16 = vector.load %arg4[%15, %c0_6, %c0_7] : memref<2x8x128xf32, #tpu.memory_space<vmem>>, vector<1x8x128xf32>
    %17 = vector.shape_cast %16 : vector<1x8x128xf32> to vector<8x128xf32>
    %18 = vector.shape_cast %14 : vector<8x128xf32> to vector<1x8x128xf32>
    tpu.vector_store %arg4[%15, %c0_6, %c0_7], %18 {strides = array<i32>} : memref<2x8x128xf32, #tpu.memory_space<vmem>>, vector<1x8x128xf32>,
    %c1_i32 = arith.constant 1 : i32
    %19 = arith.index_cast %c1_i32 : i32 to index
    %c0_8 = arith.constant 0 : index
    %c0_9 = arith.constant 0 : index
    %20 = vector.load %arg1[%19, %c0_8, %c0_9] : memref<2x16x8xf32, #tpu.memory_space<vmem>>, vector<1x16x8xf32>
    %21 = vector.shape_cast %20 : vector<1x16x8xf32> to vector<16x8xf32>
    %22 = vector.extract_strided_slice %21 {offsets = [0, 0], sizes = [8, 8], strides = [1, 1]} : vector<16x8xf32> to vector<8x8xf32>
    %23 = vector.extract_strided_slice %21 {offsets = [1, 0], sizes = [8, 8], strides = [1, 1]} : vector<16x8xf32> to vector<8x8xf32>
    %24 = vector.extract_strided_slice %21 {offsets = [2, 0], sizes = [8, 8], strides = [1, 1]} : vector<16x8xf32> to vector<8x8xf32>
    %25 = vector.extract_strided_slice %21 {offsets = [3, 0], sizes = [8, 8], strides = [1, 1]} : vector<16x8xf32> to vector<8x8xf32>
    %26 = tpu.concatenate %22, %23, %24, %25 in 1 : vector<8x8xf32>, vector<8x8xf32>, vector<8x8xf32>, vector<8x8xf32> -> vector<8x32xf32>
    %cst_10 = arith.constant dense<0.000000e+00> : vector<8x128xf32>
    %27 = tpu.matmul %26, %0, %cst_10 {dimension_numbers = #tpu.dot_dimension_numbers<[1], [0], [0], [1], [0, 0, 1, 1], [], []>} : vector<8x32xf32>, vector<32x128xf32>, vector<8x128xf32> -> vector<8x128xf32>
    %28 = vector.broadcast %1 : vector<1x128xf32> to vector<8x128xf32>
    %29 = arith.addf %27, %28 : vector<8x128xf32>
    %cst_11 = arith.constant 0.000000e+00 : f32
    %30 = vector.broadcast %cst_11 : f32 to vector<8x128xf32>
    %31 = arith.maximumf %29, %30 : vector<8x128xf32>
    %32 = arith.index_cast %c1_i32 : i32 to index
    %c0_12 = arith.constant 0 : index
    %c0_13 = arith.constant 0 : index
    %33 = vector.load %arg4[%32, %c0_12, %c0_13] : memref<2x8x128xf32, #tpu.memory_space<vmem>>, vector<1x8x128xf32>
    %34 = vector.shape_cast %33 : vector<1x8x128xf32> to vector<8x128xf32>
    %35 = vector.shape_cast %31 : vector<8x128xf32> to vector<1x8x128xf32>
    tpu.vector_store %arg4[%32, %c0_12, %c0_13], %35 {strides = array<i32>} : memref<2x8x128xf32, #tpu.memory_space<vmem>>, vector<1x8x128xf32>,
    %c2_i32 = arith.constant 2 : i32
    return
  }
  func.func @transform_0(%arg0: i32) -> (i32, i32, i32) {
    %c0_i32 = arith.constant 0 : i32
    %c0_i32_0 = arith.constant 0 : i32
    %c0_i32_1 = arith.constant 0 : i32
    return %arg0, %c0_i32, %c0_i32_0 : i32, i32, i32
  }
  func.func @transform_1(%arg0: i32) -> (i32, i32) {
    %c0_i32 = arith.constant 0 : i32
    %c0_i32_0 = arith.constant 0 : i32
    %c0_i32_1 = arith.constant 0 : i32
    return %c0_i32, %c0_i32_0 : i32, i32
  }
  func.func @transform_2(%arg0: i32) -> (i32, i32) {
    %c0_i32 = arith.constant 0 : i32
    %c0_i32_0 = arith.constant 0 : i32
    %c0_i32_1 = arith.constant 0 : i32
    return %c0_i32, %c0_i32_0 : i32, i32
  }
  func.func @transform_3(%arg0: i32) -> (i32, i32, i32) {
    %c0_i32 = arith.constant 0 : i32
    %c0_i32_0 = arith.constant 0 : i32
    %c0_i32_1 = arith.constant 0 : i32
    return %arg0, %c0_i32, %c0_i32_0 : i32, i32, i32
  }
}

</mosaic_0001>

<bundles_post_ra>
// kernel: tpu_custom_call.1
= control target key start
LH: loop header
LB: loop body
LE: loop exit
PB: predicated region body
PF: predicated region fallthrough
CT: control target
= control target key end

     0   :  { %vm31_vm0 = vcmask 1045504   ;;  %vm24_vm1 = vcmask 1046528   ;;  %s333_s26 = smov 8   ;;  %s406_s0 = inlined_call_operand.vmem [shape: f32[2,16,8], index: 0, kind: input, shape index: {}]   ;;  %s407_s1 = inlined_call_operand.vmem [shape: f32[32,128], index: 1, kind: input, shape index: {}]   ;;  %s408_s2 = inlined_call_operand.vmem [shape: f32[1,128], index: 2, kind: input, shape index: {}]   ;;  %s409_s3 = inlined_call_operand.hbm [shape: f32[2,8,128], index: 3, kind: output, shape index: {}]  }
   0x1   :  { %v20_v0 = vld [vmem:[%s406_s0] sm:$0xff]  ;;  %v21_v1 = vld [vmem:[%s406_s0 + $0x8] sm:$0xff]  ;;  %v253_v6 = vld [vmem:[%s406_s0 + $0x10] sm:$0xff] }
   0x2   :  { %v32_v2 = vrot.slane %v20_v0, 2  ;;  %v33_v3 = vrot.slane %v21_v1, 2  ;;  %v25_v4 = vrot.slane %v20_v0, 1  ;;  %v26_v5 = vrot.slane %v21_v1, 1  ;;  %v254_v7 = vld [vmem:[%s406_s0 + $0x18] sm:$0xff]  ;;  %v15_v12 = vld [vmem:[%s407_s1] sm:$0xff] }
   0x3   :  { %v144_v8 = vrot.slane %v253_v6, 2  ;;  %v145_v9 = vrot.slane %v254_v7, 2  ;;  %v138_v10 = vrot.slane %v253_v6, 1  ;;  %v139_v11 = vrot.slane %v254_v7, 1  ;;  %v16_v15 = vld [vmem:[%s407_s1 + $0x8] sm:$0xff]  ;;  %v17_v16 = vld [vmem:[%s407_s1 + $0x10] sm:$0xff] }
   0x4   :  { %v34_v13 = vsel %vm31_vm0, %v32_v2, %v33_v3  ;;  %v27_v14 = vsel %vm24_vm1, %v25_v4, %v26_v5  ;;  %s332_s0 = smov 16   ;;  %v150_v19 = vrot.slane %v253_v6, 3  ;;  %v151_v20 = vrot.slane %v254_v7, 3  ;;  %v18_v21 = vld [vmem:[%s407_s1 + $0x18] sm:$0xff] }
   0x5   :  { %35 = vrot.lane.b32.xlu1 %v34_v13, %s332_s0  ;;  %28 = vrot.lane.b32.xlu0 %v27_v14, %s333_s26  ;;  %v146_v17 = vsel %vm31_vm0, %v144_v8, %v145_v9  ;;  %v140_v18 = vsel %vm24_vm1, %v138_v10, %v139_v11 }
   0x6   :  { %8 = vsyncpa [#allocation3], 0  ;;  %v39_v22 = vrot.slane %v20_v0, 3  ;;  %v40_v23 = vrot.slane %v21_v1, 3  ;;  %v289_v24 = vpack.c.bf16 %v16_v15, %v15_v12  ;;  %vm38_vm2 = vcmask 1044480   ;;  %s337_s1 = smov 24  }
   0x7   :  { %v334_v25 = vmov 0.0|0.0   ;;  %v292_v26 = vpack.c.bf16 %v18_v21, %v17_v16  ;;  %v152_v27 = vsel %vm38_vm2, %v150_v19, %v151_v20  ;;  %vm335_vm3 = vmmov 0   ;;  %v251_v42 = vld [vmem:[%s408_s2] ss:$0 sm:$0xff]  ;;  %s338_s4 = smov [#allocation2]  }
   0x8   :  { %288 = vmatprep.subr.bf16.mxu0 %v334_v25  ;;  %294 = vmatprep.subr.bf16.mxu1 %v334_v25  ;;  %v41_v28 = vsel %vm38_vm2, %v39_v22, %v40_v23  ;;  %v336_v29 = vmov 0.0   ;;  %vm45_vm4 = vcmask 64512   ;;  %vm47_vm5 = vcmask 130048   ;;  %s240_s5 = sshll.u32 %s338_s4, 4  ;;  %s241_s5 = int_to_ptr.vmem [resolvable:$true] %s240_s5 }
   0x9   :  { %290 = vmatpush3.bf16.msra.mxu0 %v289_v24  ;;  %296 = vmatpush3.bf16.msra.mxu1 %v289_v24  ;;  %vm49_vm6 = vcmask 195584   ;;  %vm57_vm7 = vcmask 261120   ;;  %s308_s6 = scalar_lea.vmem %s241_s5, 256  ;;  %p313_p1 = scmp.lt.s32.totalorder %s241_s5, %s241_s5 }
   0xa   :  { %147 = vrot.lane.b32.xlu1 %v146_v17, %s332_s0  ;;  %141 = vrot.lane.b32.xlu0 %v140_v18, %s333_s26  ;;  %p309_p0 = scmp.ne.s32.totalorder %s241_s5, %s308_s6  ;;  %p314_p2 = scmp.lt.s32.totalorder %s308_s6, %s308_s6 }
   0xb   :  { %291 = vmatprep.subr.bf16.mxu0 %v334_v25  ;;  %297 = vmatprep.subr.bf16.mxu1 %v334_v25 }
   0xc   :  { %274 = vmatprep.mubr.msk.f32.mxu0 %vm335_vm3, %v336_v29  ;;  %285 = vmatprep.mubr.msk.f32.mxu1 %vm335_vm3, %v336_v29  ;;  %p315_p3 = por %p314_p2, %p313_p1 }
   0xd   :  { %293 = vmatpush3.bf16.msra.mxu0 %v292_v26  ;;  %299 = vmatpush3.bf16.msra.mxu1 %v292_v26 }
   0xe   :  { %153 = vrot.lane.b32.xlu1 %v152_v27, %s337_s1  ;;  %42 = vrot.lane.b32.xlu0 %v41_v28, %s337_s1  ;;  %p316_p4 = pnand %p315_p3, %p309_p0 }
  0x77   :  { %v36_v30 = vpop.permute.xlu1 %35  ;;  %v29_v31 = vpop.permute.xlu0 %28 }
  0x78   :  { %v46_v34 = vsel %vm45_vm4, %v20_v0, %v29_v31 }
  0x79   :  { %v48_v38 = vsel %vm47_vm5, %v46_v34, %v36_v30 }
  0x7c   :  { %v148_v32 = vpop.permute.xlu1 %147  ;;  %v142_v33 = vpop.permute.xlu0 %141 }
  0x7d   :  { %v156_v35 = vsel %vm45_vm4, %v253_v6, %v142_v33 }
  0x7e   :  { %v157_v37 = vsel %vm47_vm5, %v156_v35, %v148_v32 }
  0x80   :  { %v154_v36 = vpop.permute.xlu1 %153  ;;  %v43_v39 = vpop.permute.xlu0 %42 }
  0x81   :  { %v158_v40 = vsel %vm49_vm6, %v157_v37, %v154_v36  ;;  %v50_v41 = vsel %vm49_vm6, %v48_v38, %v43_v39 }
  0x82   :  { %275 = vmatmul.mubr.msk.f32.vlgmr.msra.gmra.mrb[0].mxu0 %vm57_vm7, %v50_v41  ;;  %286 = vmatmul.mubr.msk.f32.vlgmr.msra.gmra.mrb[0].mxu1 %vm57_vm7, %v158_v40 }
 0x155   :  { %v127_v43 = vpop.f32.mrb[0].mxu0  ;;  %v228_v44 = vpop.f32.mrb[0].mxu1 }
 0x156   :  { %v128_v45 = vadd.f32 %v251_v42, %v127_v43  ;;  %v229_v46 = vadd.f32 %v251_v42, %v228_v44  ;;  %v276_v47 = vpop.f32.mrb[1].mxu0  ;;  %v287_v48 = vpop.f32.mrb[1].mxu1 }
 0x158   :  { %v131_v49 = vmax.f32 %v128_v45, 0.0  ;;  %v232_v50 = vmax.f32 %v229_v46, 0.0 }
 0x15a   :  { %132 = vst [vmem:[#allocation2] sm:$0xff] %v131_v49  ;;  %234 = vst [vmem:[#allocation2 + $0x8] sm:$0xff] %v232_v50 }
 0x15b   :  { %319 = shalt.err (!%p316_p4)
}
 0x15c   :  { %s320_s8 = scalar_lea.hbm %s409_s3, 256 }
 0x15d   :  { %p321_p5 = scmp.ne.s32.totalorder %s409_s3, %s320_s8  ;;  %p324_p6 = scmp.lt.u32.totalorder %s320_s8, %s409_s3 }
 0x15f   :  { %p326_p7 = pnand %p324_p6, %p321_p5 }
 0x161   :  { %329 = shalt.err (!%p326_p7)
}
 0x162   :  { %s339_s13 = smov 128  }
 0x163   :  { %246 = dma.vmem_to_hbm [thread:$0]  %s241_s5, 256, %s409_s3, [#allocation3], %s339_s13, %s339_s13, %s333_s26  }
 0x164   :  { %330 = dma.done.wait [#allocation3], 256  }
 0x165   :  { %331 = vsyncadd [#allocation3], 4294967040 }
 0x166   :  { %250 = vsyncpa [#allocation3], 1 }

</bundles_post_ra>
